<compile_context>
chip_gen: v6e
topology: v6e:2x2x1
jax: 0.10.0
libtpu: 0.0.40
codegen_flags: <defaults>
</compile_context>

<pallas_src>
import numpy as np
import jax
import jax.numpy as jnp
from jax.experimental import pallas as pl
from jax.experimental.pallas import tpu as pltpu


DOA_PAD = 128  # lane-dense width for the 3-component DOA output head


def binaural_kernel(x_ref, dft_ref, idftw1_ref, b1_ref, w2_ref, b2_ref,
                    w3_ref, b3_ref, doa_ref):
    L = x_ref.shape[-1]
    tm = x_ref.shape[1]

    # Stack both channels along rows: one DFT matmul, RHS pushed to MXU once.
    x = x_ref[...].reshape(2 * tm, L)                                # bf16
    # Fused DFT: dft_ref = [cos | -sin] (L, 2L); bf16 in, f32 accumulation.
    X = jnp.dot(x, dft_ref[...], preferred_element_type=jnp.float32)  # (2*tm, 2L)
    X1, X2 = X[:tm], X[tm:]                       # sublane-aligned free views
    X1r, X1i = X1[:, :L], X1[:, L:]
    X2r, X2i = X2[:, :L], X2[:, L:]

    # Cross power spectrum C = X1 * conj(X2) with PHAT weighting (f32 VPU+EUP).
    Cr = X1r * X2r + X1i * X2i
    Ci = X1i * X2r - X1r * X2i
    inv_mag = jax.lax.rsqrt(Cr * Cr + Ci * Ci + 1e-6)

    # Inverse DFT restricted to the central lag bins with the first MLP layer
    # folded in offline: idftw1_ref = [[idft_c], [-idft_s]] @ w1, K = 2L.
    C = jnp.concatenate([Cr * inv_mag, Ci * inv_mag], axis=-1).astype(jnp.bfloat16)
    h1 = jnp.maximum(
        jnp.dot(C, idftw1_ref[...], preferred_element_type=jnp.float32)
        + b1_ref[...], 0.0)
    h2 = jnp.maximum(
        jnp.dot(h1.astype(jnp.bfloat16), w2_ref[...],
                preferred_element_type=jnp.float32) + b2_ref[...], 0.0)
    # w3 / b3 are zero-padded to DOA_PAD lanes -> lane-dense unmasked stores.
    out = jnp.dot(h2.astype(jnp.bfloat16), w3_ref[...],
                  preferred_element_type=jnp.float32) + b3_ref[...]   # (tm, DOA_PAD)

    # Unit-norm Cartesian DOA via one EUP rsqrt.  Padded lanes are exactly
    # zero (zero weights & bias), so the full-lane norm equals the 3-lane norm.
    inv_norm = jax.lax.rsqrt(jnp.sum(out * out, axis=-1, keepdims=True) + 1e-12)
    doa_ref[...] = (out * inv_norm).astype(doa_ref.dtype)


def make_dft_matrices(frame_len, nb_gcc_bins):
    """Fused DFT / inverse-DFT matrices (f32; caller casts / folds)."""
    L = frame_len
    n = np.arange(L)[:, None]
    k = np.arange(L)[None, :]
    ang = 2.0 * np.pi * n * k / L
    dft_cat = np.concatenate([np.cos(ang), -np.sin(ang)], axis=1)        # (L, 2L)
    lags = np.arange(-(nb_gcc_bins // 2), nb_gcc_bins - nb_gcc_bins // 2)
    ang2 = 2.0 * np.pi * np.arange(L)[:, None] * lags[None, :] / L
    idft_c = np.cos(ang2) / L
    idft_s = np.sin(ang2) / L
    idft_cat = np.concatenate([idft_c, -idft_s], axis=0)                 # (2L, nb)
    return (jnp.asarray(dft_cat.astype(np.float32)),
            jnp.asarray(idft_cat.astype(np.float32)))


def init_localizer_params(nb_gcc_bins, hidden, key):
    k1, k2, k3 = jax.random.split(key, 3)
    w1 = jax.random.normal(k1, (nb_gcc_bins, hidden), jnp.float32) * 0.05
    b1 = jnp.zeros((1, hidden), jnp.float32)
    w2 = jax.random.normal(k2, (hidden, hidden), jnp.float32) * 0.05
    b2 = jnp.zeros((1, hidden), jnp.float32)
    w3 = jax.random.normal(k3, (hidden, 3), jnp.float32) * 0.05
    b3 = jnp.zeros((1, 3), jnp.float32)
    return w1, b1, w2, b2, w3, b3


def _round_up(x, m):
    return ((x + m - 1) // m) * m


def binaural_one_source_forward(signal, params, frame_len, nb_gcc_bins, hidden,
                                tm=512):
    """signal: (B, 2, N) float32.  Returns {'doa_cart': (B, F, 3) float32}."""
    B, C, N = signal.shape
    assert C == 2, "binaural signal must have 2 channels"
    L = frame_len
    F = N // L
    M = B * F

    # Tile sizing: big tiles amortize the ~0.35 us per-grid-step overhead, but
    # keep >= 2 grid steps when possible so v7x megacore can shard the axis.
    if M > 8:
        tm = min(tm, _round_up((M + 1) // 2, 8))
    tm = max(_round_up(min(tm, max(M, 1)), 8), 8)
    Mp = _round_up(M, tm)

    # Wrapper prep in one low-byte pass: cast to bf16 first, then frame /
    # channel-major / pad into a single (2, Mp, L) slab for the kernel.
    sig = signal[:, :, :F * L].astype(jnp.bfloat16)
    x = jnp.moveaxis(sig.reshape(B, 2, F, L), 1, 0).reshape(2, M, L)
    if Mp != M:
        x = jnp.pad(x, ((0, 0), (0, Mp - M), (0, 0)))

    dft_cat, idft_cat = make_dft_matrices(L, nb_gcc_bins)
    w1, b1, w2, b2, w3, b3 = params
    # Fold the first MLP layer into the inverse DFT: gcc_phat is not part of
    # the module's forward output, so it is never materialized in HBM.
    idft_w1 = jnp.dot(idft_cat, w1, precision=jax.lax.Precision.HIGHEST)

    dft_b = dft_cat.astype(jnp.bfloat16)
    idft_w1b = idft_w1.astype(jnp.bfloat16)
    w2b = w2.astype(jnp.bfloat16)
    # Zero-pad the 3-wide output head to a full 128-lane head (lane-dense).
    w3p = jnp.zeros((hidden, DOA_PAD), jnp.float32).at[:, :3].set(w3)
    w3p = w3p.astype(jnp.bfloat16)
    b3p = jnp.zeros((1, DOA_PAD), jnp.float32).at[:, :3].set(b3)

    row3 = lambda shape: pl.BlockSpec(shape, lambda i: (0, i, 0))
    row2 = lambda shape: pl.BlockSpec(shape, lambda i: (i, 0))
    full = lambda shape: pl.BlockSpec(shape, lambda i: (0, 0))

    doa = pl.pallas_call(
        binaural_kernel,
        out_shape=jax.ShapeDtypeStruct((Mp, DOA_PAD), jnp.bfloat16),
        grid=(Mp // tm,),
        in_specs=[
            row3((2, tm, L)),                     # stacked binaural frames
            full((L, 2 * L)),                     # fused DFT [cos | -sin]
            full((2 * L, hidden)), full((1, hidden)),   # idft @ w1, b1
            full((hidden, hidden)), full((1, hidden)),  # w2, b2
            full((hidden, DOA_PAD)), full((1, DOA_PAD)),  # padded w3, b3
        ],
        out_specs=row2((tm, DOA_PAD)),
        compiler_params=pltpu.CompilerParams(
            dimension_semantics=("parallel",),
            vmem_limit_bytes=32 * 1024 * 1024),
    )(x, dft_b, idft_w1b, b1, w2b, b2, w3p, b3p)

    doa_cart = doa[:M, :3].astype(jnp.float32).reshape(B, F, 3)
    return {"doa_cart": doa_cart}


def reference_forward(signal, params, frame_len, nb_gcc_bins, hidden):
    """Pure-JAX f32 reference of the same pipeline (sanity diff only)."""
    B, _, N = signal.shape
    L = frame_len
    F = N // L
    M = B * F
    frames = signal[:, :, :F * L].reshape(B, 2, F, L)
    x1 = frames[:, 0].reshape(M, L)
    x2 = frames[:, 1].reshape(M, L)
    dft_cat, idft_cat = make_dft_matrices(L, nb_gcc_bins)
    hi = jax.lax.Precision.HIGHEST
    X1 = jnp.dot(x1, dft_cat, precision=hi)
    X2 = jnp.dot(x2, dft_cat, precision=hi)
    X1r, X1i = X1[:, :L], X1[:, L:]
    X2r, X2i = X2[:, :L], X2[:, L:]
    Cr = X1r * X2r + X1i * X2i
    Ci = X1i * X2r - X1r * X2i
    inv_mag = jax.lax.rsqrt(Cr * Cr + Ci * Ci + 1e-6)
    Cc = jnp.concatenate([Cr * inv_mag, Ci * inv_mag], axis=-1)
    gcc = jnp.dot(Cc, idft_cat, precision=hi)
    w1, b1, w2, b2, w3, b3 = params
    h1 = jnp.maximum(jnp.dot(gcc, w1, precision=hi) + b1, 0.0)
    h2 = jnp.maximum(jnp.dot(h1, w2, precision=hi) + b2, 0.0)
    out = jnp.dot(h2, w3, precision=hi) + b3
    doa = out * jax.lax.rsqrt(jnp.sum(out * out, -1, keepdims=True) + 1e-12)
    return doa.reshape(B, F, 3)


if __name__ == "__main__":
    # Small deterministic configuration.
    B = 3                 # batch of binaural recordings
    frame_len = 128       # samples per analysis frame
    n_frames = 24
    N = frame_len * n_frames
    nb_gcc_bins = 128     # params['nb_gcc_bins']
    hidden = 128

    key = jax.random.PRNGKey(0)
    k_sig, k_par = jax.random.split(key)
    signal = jax.random.normal(k_sig, (B, 2, N), jnp.float32)
    params = init_localizer_params(nb_gcc_bins, hidden, k_par)

    # Default (production) tm=512; the wrapper auto-balances it down so this
    # tiny demo still runs a 2-step "parallel" grid with a zero-padded last
    # tile (exercising both the multi-step and padded paths).
    out = binaural_one_source_forward(signal, params, frame_len, nb_gcc_bins,
                                      hidden)
    jax.block_until_ready(out["doa_cart"])
    assert out["doa_cart"].shape == (B, n_frames, 3)
    assert bool(jnp.all(jnp.isfinite(out["doa_cart"])))

    ref = reference_forward(signal, params, frame_len, nb_gcc_bins, hidden)
    err = float(jnp.max(jnp.abs(out["doa_cart"] - ref)))
    print(f"doa_cart shape: {out['doa_cart'].shape}, "
          f"max |pallas(bf16) - ref(f32)| = {err:.2e}")
    print("KERNEL_OK")
</pallas_src>

<mosaic_0001>
module attributes {stable_mosaic.version = 11 : i64} {
  func.func @binaural_kernel(%arg0: i32, %arg1: memref<2x40x128xbf16, #tpu.memory_space<vmem>>, %arg2: memref<128x256xbf16, #tpu.memory_space<vmem>>, %arg3: memref<256x128xbf16, #tpu.memory_space<vmem>>, %arg4: memref<1x128xf32, #tpu.memory_space<vmem>>, %arg5: memref<128x128xbf16, #tpu.memory_space<vmem>>, %arg6: memref<1x128xf32, #tpu.memory_space<vmem>>, %arg7: memref<128x128xbf16, #tpu.memory_space<vmem>>, %arg8: memref<1x128xf32, #tpu.memory_space<vmem>>, %arg9: memref<40x128xbf16, #tpu.memory_space<vmem>>) attributes {dimension_semantics = [#tpu.dimension_semantics<parallel>], iteration_bounds = array<i64: 2>, scalar_prefetch = 0 : i64, scratch_operands = 0 : i64, tpu.core_type = #tpu.core_type<tc>, window_params = [{transform_indices = @transform_0, window_bounds = array<i64: 2, 40, 128>}, {pipeline_mode = #tpu.pipeline_mode<synchronous>, transform_indices = @transform_1, window_bounds = array<i64: 128, 256>}, {pipeline_mode = #tpu.pipeline_mode<synchronous>, transform_indices = @transform_2, window_bounds = array<i64: 256, 128>}, {pipeline_mode = #tpu.pipeline_mode<synchronous>, transform_indices = @transform_3, window_bounds = array<i64: 1, 128>}, {pipeline_mode = #tpu.pipeline_mode<synchronous>, transform_indices = @transform_4, window_bounds = array<i64: 128, 128>}, {pipeline_mode = #tpu.pipeline_mode<synchronous>, transform_indices = @transform_5, window_bounds = array<i64: 1, 128>}, {pipeline_mode = #tpu.pipeline_mode<synchronous>, transform_indices = @transform_6, window_bounds = array<i64: 128, 128>}, {pipeline_mode = #tpu.pipeline_mode<synchronous>, transform_indices = @transform_7, window_bounds = array<i64: 1, 128>}, {transform_indices = @transform_8, window_bounds = array<i64: 40, 128>}]} {
    %c0 = arith.constant 0 : index
    %c0_0 = arith.constant 0 : index
    %c0_1 = arith.constant 0 : index
    %0 = vector.load %arg1[%c0, %c0_0, %c0_1] : memref<2x40x128xbf16, #tpu.memory_space<vmem>>, vector<2x40x128xbf16>
    %1 = vector.shape_cast %0 : vector<2x40x128xbf16> to vector<80x128xbf16>
    %c0_2 = arith.constant 0 : index
    %c0_3 = arith.constant 0 : index
    %2 = vector.load %arg2[%c0_2, %c0_3] : memref<128x256xbf16, #tpu.memory_space<vmem>>, vector<128x256xbf16>
    %cst = arith.constant dense<0.000000e+00> : vector<80x256xf32>
    %3 = tpu.matmul %1, %2, %cst {dimension_numbers = #tpu.dot_dimension_numbers<[1], [0], [0], [1], [0, 0, 1, 1], [], []>} : vector<80x128xbf16>, vector<128x256xbf16>, vector<80x256xf32> -> vector<80x256xf32>
    %4 = vector.extract_strided_slice %3 {offsets = [0, 0], sizes = [40, 256], strides = [1, 1]} : vector<80x256xf32> to vector<40x256xf32>
    %5 = vector.extract_strided_slice %3 {offsets = [40, 0], sizes = [40, 256], strides = [1, 1]} : vector<80x256xf32> to vector<40x256xf32>
    %6 = vector.extract_strided_slice %4 {offsets = [0, 0], sizes = [40, 128], strides = [1, 1]} : vector<40x256xf32> to vector<40x128xf32>
    %7 = vector.extract_strided_slice %4 {offsets = [0, 128], sizes = [40, 128], strides = [1, 1]} : vector<40x256xf32> to vector<40x128xf32>
    %8 = vector.extract_strided_slice %5 {offsets = [0, 0], sizes = [40, 128], strides = [1, 1]} : vector<40x256xf32> to vector<40x128xf32>
    %9 = vector.extract_strided_slice %5 {offsets = [0, 128], sizes = [40, 128], strides = [1, 1]} : vector<40x256xf32> to vector<40x128xf32>
    %10 = arith.mulf %6, %8 : vector<40x128xf32>
    %11 = arith.mulf %7, %9 : vector<40x128xf32>
    %12 = arith.addf %10, %11 : vector<40x128xf32>
    %13 = arith.mulf %7, %8 : vector<40x128xf32>
    %14 = arith.mulf %6, %9 : vector<40x128xf32>
    %15 = arith.subf %13, %14 : vector<40x128xf32>
    %16 = arith.mulf %12, %12 : vector<40x128xf32>
    %17 = arith.mulf %15, %15 : vector<40x128xf32>
    %18 = arith.addf %16, %17 : vector<40x128xf32>
    %cst_4 = arith.constant 9.99999997E-7 : f32
    %19 = vector.broadcast %cst_4 : f32 to vector<40x128xf32>
    %20 = arith.addf %18, %19 : vector<40x128xf32>
    %21 = math.rsqrt %20 : vector<40x128xf32>
    %22 = arith.mulf %12, %21 : vector<40x128xf32>
    %23 = arith.mulf %15, %21 : vector<40x128xf32>
    %24 = tpu.concatenate %22, %23 in 1 : vector<40x128xf32>, vector<40x128xf32> -> vector<40x256xf32>
    %25 = arith.truncf %24 : vector<40x256xf32> to vector<40x256xbf16>
    %c0_5 = arith.constant 0 : index
    %c0_6 = arith.constant 0 : index
    %26 = vector.load %arg3[%c0_5, %c0_6] : memref<256x128xbf16, #tpu.memory_space<vmem>>, vector<256x128xbf16>
    %cst_7 = arith.constant dense<0.000000e+00> : vector<40x128xf32>
    %27 = tpu.matmul %25, %26, %cst_7 {dimension_numbers = #tpu.dot_dimension_numbers<[1], [0], [0], [1], [0, 0, 1, 1], [], []>} : vector<40x256xbf16>, vector<256x128xbf16>, vector<40x128xf32> -> vector<40x128xf32>
    %c0_8 = arith.constant 0 : index
    %c0_9 = arith.constant 0 : index
    %28 = vector.load %arg4[%c0_8, %c0_9] : memref<1x128xf32, #tpu.memory_space<vmem>>, vector<1x128xf32>
    %29 = vector.broadcast %28 : vector<1x128xf32> to vector<40x128xf32>
    %30 = arith.addf %27, %29 : vector<40x128xf32>
    %cst_10 = arith.constant 0.000000e+00 : f32
    %31 = vector.broadcast %cst_10 : f32 to vector<40x128xf32>
    %32 = arith.maximumf %30, %31 : vector<40x128xf32>
    %33 = arith.truncf %32 : vector<40x128xf32> to vector<40x128xbf16>
    %c0_11 = arith.constant 0 : index
    %c0_12 = arith.constant 0 : index
    %34 = vector.load %arg5[%c0_11, %c0_12] : memref<128x128xbf16, #tpu.memory_space<vmem>>, vector<128x128xbf16>
    %cst_13 = arith.constant dense<0.000000e+00> : vector<40x128xf32>
    %35 = tpu.matmul %33, %34, %cst_13 {dimension_numbers = #tpu.dot_dimension_numbers<[1], [0], [0], [1], [0, 0, 1, 1], [], []>} : vector<40x128xbf16>, vector<128x128xbf16>, vector<40x128xf32> -> vector<40x128xf32>
    %c0_14 = arith.constant 0 : index
    %c0_15 = arith.constant 0 : index
    %36 = vector.load %arg6[%c0_14, %c0_15] : memref<1x128xf32, #tpu.memory_space<vmem>>, vector<1x128xf32>
    %37 = vector.broadcast %36 : vector<1x128xf32> to vector<40x128xf32>
    %38 = arith.addf %35, %37 : vector<40x128xf32>
    %cst_16 = arith.constant 0.000000e+00 : f32
    %39 = vector.broadcast %cst_16 : f32 to vector<40x128xf32>
    %40 = arith.maximumf %38, %39 : vector<40x128xf32>
    %41 = arith.truncf %40 : vector<40x128xf32> to vector<40x128xbf16>
    %c0_17 = arith.constant 0 : index
    %c0_18 = arith.constant 0 : index
    %42 = vector.load %arg7[%c0_17, %c0_18] : memref<128x128xbf16, #tpu.memory_space<vmem>>, vector<128x128xbf16>
    %cst_19 = arith.constant dense<0.000000e+00> : vector<40x128xf32>
    %43 = tpu.matmul %41, %42, %cst_19 {dimension_numbers = #tpu.dot_dimension_numbers<[1], [0], [0], [1], [0, 0, 1, 1], [], []>} : vector<40x128xbf16>, vector<128x128xbf16>, vector<40x128xf32> -> vector<40x128xf32>
    %c0_20 = arith.constant 0 : index
    %c0_21 = arith.constant 0 : index
    %44 = vector.load %arg8[%c0_20, %c0_21] : memref<1x128xf32, #tpu.memory_space<vmem>>, vector<1x128xf32>
    %45 = vector.broadcast %44 : vector<1x128xf32> to vector<40x128xf32>
    %46 = arith.addf %43, %45 : vector<40x128xf32>
    %47 = arith.mulf %46, %46 : vector<40x128xf32>
    %cst_22 = arith.constant dense<0.000000e+00> : vector<40xf32>
    %48 = vector.multi_reduction <add>, %47, %cst_22 [1] : vector<40x128xf32> to vector<40xf32>
    %49 = vector.shape_cast %48 : vector<40xf32> to vector<40x1xf32>
    %cst_23 = arith.constant 9.99999996E-13 : f32
    %50 = vector.broadcast %cst_23 : f32 to vector<40x1xf32>
    %51 = arith.addf %49, %50 : vector<40x1xf32>
    %52 = math.rsqrt %51 : vector<40x1xf32>
    %53 = vector.broadcast %52 : vector<40x1xf32> to vector<40x128xf32>
    %54 = arith.mulf %46, %53 : vector<40x128xf32>
    %55 = arith.truncf %54 : vector<40x128xf32> to vector<40x128xbf16>
    %c0_24 = arith.constant 0 : index
    %c0_25 = arith.constant 0 : index
    %56 = vector.load %arg9[%c0_24, %c0_25] : memref<40x128xbf16, #tpu.memory_space<vmem>>, vector<40x128xbf16>
    tpu.vector_store %arg9[%c0_24, %c0_25], %55 {strides = array<i32>} : memref<40x128xbf16, #tpu.memory_space<vmem>>, vector<40x128xbf16>,
    return
  }
  func.func @transform_0(%arg0: i32) -> (i32, i32, i32) {
    %c0_i32 = arith.constant 0 : i32
    %c0_i32_0 = arith.constant 0 : i32
    %c0_i32_1 = arith.constant 0 : i32
    return %c0_i32, %arg0, %c0_i32_0 : i32, i32, i32
  }
  func.func @transform_1(%arg0: i32) -> (i32, i32) {
    %c0_i32 = arith.constant 0 : i32
    %c0_i32_0 = arith.constant 0 : i32
    %c0_i32_1 = arith.constant 0 : i32
    return %c0_i32, %c0_i32_0 : i32, i32
  }
  func.func @transform_2(%arg0: i32) -> (i32, i32) {
    %c0_i32 = arith.constant 0 : i32
    %c0_i32_0 = arith.constant 0 : i32
    %c0_i32_1 = arith.constant 0 : i32
    return %c0_i32, %c0_i32_0 : i32, i32
  }
  func.func @transform_3(%arg0: i32) -> (i32, i32) {
    %c0_i32 = arith.constant 0 : i32
    %c0_i32_0 = arith.constant 0 : i32
    %c0_i32_1 = arith.constant 0 : i32
    return %c0_i32, %c0_i32_0 : i32, i32
  }
  func.func @transform_4(%arg0: i32) -> (i32, i32) {
    %c0_i32 = arith.constant 0 : i32
    %c0_i32_0 = arith.constant 0 : i32
    %c0_i32_1 = arith.constant 0 : i32
    return %c0_i32, %c0_i32_0 : i32, i32
  }
  func.func @transform_5(%arg0: i32) -> (i32, i32) {
    %c0_i32 = arith.constant 0 : i32
    %c0_i32_0 = arith.constant 0 : i32
    %c0_i32_1 = arith.constant 0 : i32
    return %c0_i32, %c0_i32_0 : i32, i32
  }
  func.func @transform_6(%arg0: i32) -> (i32, i32) {
    %c0_i32 = arith.constant 0 : i32
    %c0_i32_0 = arith.constant 0 : i32
    %c0_i32_1 = arith.constant 0 : i32
    return %c0_i32, %c0_i32_0 : i32, i32
  }
  func.func @transform_7(%arg0: i32) -> (i32, i32) {
    %c0_i32 = arith.constant 0 : i32
    %c0_i32_0 = arith.constant 0 : i32
    %c0_i32_1 = arith.constant 0 : i32
    return %c0_i32, %c0_i32_0 : i32, i32
  }
  func.func @transform_8(%arg0: i32) -> (i32, i32) {
    %c0_i32 = arith.constant 0 : i32
    %c0_i32_0 = arith.constant 0 : i32
    return %arg0, %c0_i32 : i32, i32
  }
}

</mosaic_0001>

<bundles_post_ra>
// kernel: tpu_custom_call.1
= control target key start
LH: loop header
LB: loop body
LE: loop exit
PB: predicated region body
PF: predicated region fallthrough
CT: control target
= control target key end

     0   :  { %s2234_s0 = inlined_call_operand.hbm [shape: bf16[2,80,128], index: 0, kind: input, shape index: {}]   ;;  %s2235_s1 = inlined_call_operand.hbm [shape: bf16[128,256], index: 1, kind: input, shape index: {}]   ;;  %s2236_s2 = inlined_call_operand.hbm [shape: bf16[256,128], index: 2, kind: input, shape index: {}]   ;;  %s2237_s3 = inlined_call_operand.vmem [shape: f32[1,128], index: 3, kind: input, shape index: {}]   ;;  %s2238_s4 = inlined_call_operand.hbm [shape: bf16[128,128], index: 4, kind: input, shape index: {}]   ;;  %s2239_s5 = inlined_call_operand.vmem [shape: f32[1,128], index: 5, kind: input, shape index: {}]   ;;  %s2240_s6 = inlined_call_operand.hbm [shape: bf16[128,128], index: 6, kind: input, shape index: {}]   ;;  %s2241_s7 = inlined_call_operand.vmem [shape: f32[1,128], index: 7, kind: input, shape index: {}]   ;;  %s2242_s8 = inlined_call_operand.hbm [shape: bf16[80,128], index: 8, kind: output, shape index: {}]  }
   0x1   :  { %2245 = sst [smem:[#allocation19_spill]] %s2235_s1 }
   0x2   :  { %2246 = sst [smem:[#allocation20_spill]] %s2236_s2 }
   0x3   :  { %2247 = sst [smem:[#allocation21_spill]] %s2238_s4 }
   0x4   :  { %2248 = sst [smem:[#allocation22_spill]] %s2240_s6 }
   0x5   :  { %13 = vsyncpa [#allocation3], 0 }
   0x6   :  { %15 = vsyncpa [#allocation3 + $0x1], 0 }
   0x7   :  { %16 = vsyncpa [#allocation6], 0 }
   0x8   :  { %17 = vsyncpa [#allocation9], 0 }
   0x9   :  { %18 = vsyncpa [#allocation4], 0 }
   0xa   :  { %20 = vsyncpa [#allocation4 + $0x1], 0  ;;  %s1982_s27 = smov 0   ;;  %s1984_s28 = smov 0  }
   0xb   :  { %s1986_s29 = smov 0   ;;  %s1988_s30 = smov 0  }
   0xc LB: > { %s2003_s9 = sadd.s32 4294967295, %s1915_s30   ;;  %s1342_s10 = sadd.s32 4294967294, %s1915_s30   ;;  %s1915_s30 = sphi %s1988_s30, %s2268_s30   ;;  %s1911_s29 = sphi %s1986_s29, %s2267_s29   ;;  %s1907_s28 = sphi %s1984_s28, %s2266_s28   ;;  %s1903_s27 = sphi %s1982_s27, %s2265_s27  }
   0xd   : > { %s2007_s11 = sadd.s32 1, %s1915_s30   ;;  %s33_s12 = sadd.s32 1, %s1911_s29 }
   0xe   : > { %s30_s13 = ssub.s32 %s1915_s30, %s2007_s11  ;;  %p40_p0 = scmp.ne.s32.totalorder %s1911_s29, %s1907_s28 }
   0xf   : > { %p31_p1 = scmp.eq.s32.totalorder %s30_s13, 0  ;;  %p41_p2 = scmp.eq.s32.totalorder %s1915_s30, 0 }
  0x10   : > { %p46_p3 = scmp.ne.s32.totalorder %s1907_s28, %s1903_s27  ;;  %p2244_p4 = scmp.eq.s32.totalorder %s2003_s9, 0 }
  0x11   : > { %s2019_s14 = scalar_select %p31_p1, %s1911_s29, %s33_s12  }
  0x12   : > { %p2021_p5 = por %p41_p2, %p40_p0  ;;  %p2027_p6 = por %p2244_p4, %p46_p3 }
  0x13   : > { %p217_p7 = scmp.eq.s32.totalorder %s2003_s9, 1  ;;  %p223_p8 = scmp.eq.s32.totalorder %s1342_s10, 1 }
  0x14   : > { %p1343_p9 = scmp.ge.s32.totalorder %s1915_s30, 1  ;;  %p230_p10 = scmp.lt.s32.totalorder %s1915_s30, 3 }
  0x15   : > { %p2034_p11 = por %p217_p7, %p40_p0  ;;  %p2038_p12 = por %p223_p8, %p46_p3 }
  0x16   : > { %p2042_p13 = pnand %p1343_p9, %p230_p10  ;;  %s1917_s20 = smov [#allocation5]  }
  0x17   : > { %s2251_s17 = scalar_select %p2034_p11, 1, 0 }
  0x18   : > { %s2252_s18 = scalar_select %p2038_p12, 1, 0 }
  0x19   : > { %p1581_p1 = pneg %p2042_p13  ;;  %s242_s21 = sshll.u32 %s1917_s20, 4  ;;  %s243_s21 = int_to_ptr.vmem [resolvable:$true] %s242_s21 }
  0x1a   : > { %s1918_s23 = smov [#allocation8]   ;;  %s1750_s25 = scalar_lea.vmem %s243_s21, 2048 }
  0x1b   : > { %p2050_p2 = pnand %p1581_p1, %p2244_p4  ;;  %s271_s24 = sshll.u32 %s1918_s23, 4  ;;  %s272_s24 = int_to_ptr.vmem [resolvable:$true] %s271_s24 }
  0x1c   : > { %p1751_p3 = scmp.ne.s32.totalorder %s243_s21, %s1750_s25  ;;  %p1758_p9 = scmp.lt.s32.totalorder %s243_s21, %s243_s21 }
  0x1d   : > { %p1741_p0 = pneg %p2050_p2  ;;  %p1759_p10 = scmp.lt.s32.totalorder %s1750_s25, %s1750_s25 }
  0x1f   : > { %p1753_p7 = pnand %p1751_p3, %p1741_p0  ;;  %p1760_p12 = por %p1759_p10, %p1758_p9 }
  0x21   : > { %p1754_p8 = pneg %p1753_p7 }
  0x23   : > { %p1761_p11 = pnand %p1760_p12, %p1754_p8 }
  0x25   : > { %1764 = shalt.err (!%p1761_p11)
}
  0x26   : > { %s1919_s26 = smov 128   ;;  %s1920_s10 = smov 8  }
  0x27   : > { %s2255_s1 = sld [smem:[#allocation19_spill]]  ;;  %s1776_s20 = scalar_lea.vmem %s272_s24, 1024 }
  0x28   : > { %p1777_p1 = scmp.ne.s32.totalorder %s272_s24, %s1776_s20  ;;  %p1784_p4 = scmp.lt.s32.totalorder %s272_s24, %s272_s24 }
  0x29   : > { %p1785_p9 = scmp.lt.s32.totalorder %s1776_s20, %s1776_s20 }
  0x2a   : > { %p1779_p3 = pnand %p1777_p1, %p1741_p0 }
  0x2b   : > { %p1786_p12 = por %p1785_p9, %p1784_p4 }
  0x2c   : > { %p1780_p7 = pneg %p1779_p3 }
  0x2d   : > { %1584 = dma.hbm_to_vmem [thread:$0]  (!%p2050_p2), %s2255_s1, 2048, %s243_s21, [#allocation6], %s1919_s26, %s1919_s26, %s1920_s10  }
  0x2e   : > { %p1787_p11 = pnand %p1786_p12, %p1780_p7 }
  0x30   : > { %1790 = shalt.err (!%p1787_p11)
}
  0x31   : > { %s1921_s23 = smov 64   ;;  %s1922_s25 = smov 4  }
  0x32   : > { %s2256_s4 = sld [smem:[#allocation21_spill]]  ;;  %s1923_s10 = smov [#allocation7]  }
  0x33   : > { %s255_s12 = sshll.u32 %s1923_s10, 4  ;;  %s1924_s13 = smov [#allocation10]   ;;  %s256_s12 = int_to_ptr.vmem [resolvable:$true] %s255_s12 }
  0x34   : > { %s287_s20 = sshll.u32 %s1924_s13, 4  ;;  %s1802_s1 = scalar_lea.vmem %s256_s12, 2048  ;;  %s288_s20 = int_to_ptr.vmem [resolvable:$true] %s287_s20 }
  0x35   : > { %p1803_p4 = scmp.ne.s32.totalorder %s256_s12, %s1802_s1  ;;  %p1810_p1 = scmp.lt.s32.totalorder %s256_s12, %s256_s12 }
  0x36   : > { %p1811_p3 = scmp.lt.s32.totalorder %s1802_s1, %s1802_s1 }
  0x37   : > { %p1805_p8 = pnand %p1803_p4, %p1741_p0 }
  0x38   : > { %1590 = dma.hbm_to_vmem [thread:$0]  (!%p2050_p2), %s2256_s4, 1024, %s272_s24, [#allocation9], %s1921_s23, %s1921_s23, %s1922_s25  }
  0x39   : > { %p1806_p10 = pneg %p1805_p8  ;;  %p1812_p7 = por %p1811_p3, %p1810_p1 }
  0x3b   : > { %p1813_p9 = pnand %p1812_p7, %p1806_p10 }
  0x3d   : > { %1816 = shalt.err (!%p1813_p9)
}
  0x3e   : > { %s2257_s2 = sld [smem:[#allocation20_spill]]  ;;  %s1828_s26 = scalar_lea.vmem %s288_s20, 1024 }
  0x3f   : > { %p1829_p12 = scmp.ne.s32.totalorder %s288_s20, %s1828_s26  ;;  %p1836_p8 = scmp.lt.s32.totalorder %s288_s20, %s288_s20 }
  0x40   : > { %p1837_p10 = scmp.lt.s32.totalorder %s1828_s26, %s1828_s26 }
  0x41   : > { %p1831_p11 = pnand %p1829_p12, %p1741_p0 }
  0x42   : > { %p1838_p1 = por %p1837_p10, %p1836_p8 }
  0x43   : > { %p1832_p4 = pneg %p1831_p11 }
  0x44   : > { %1587 = dma.hbm_to_vmem [thread:$0]  (!%p2050_p2), %s2257_s2, 2048, %s256_s12, [#allocation6], %s1921_s23, %s1921_s23, %s1922_s25  }
  0x45   : > { %p1839_p3 = pnand %p1838_p1, %p1832_p4 }
  0x47   : > { %1842 = shalt.err (!%p1839_p3)
}
  0x48   : > { %s2258_s6 = sld [smem:[#allocation22_spill]]  ;;  %p1348_p7 = scmp.ge.s32.totalorder %s1915_s30, 2 }
  0x4a   : > { %300 = sbr.rel (%p1348_p7) target bundleno = 93 (0x5d), region = 44 }
  0x4e   : > { %1593 = dma.hbm_to_vmem [thread:$0]  (!%p2050_p2), %s2258_s6, 1024, %s288_s20, [#allocation9], %s1921_s23, %s1921_s23, %s1922_s25  }
  0x4f   : > { %s304_s22 = sand.u32 1, %s1911_s29   ;;  %s1421_s12 = smul.u32 320, %s1915_s30 }
  0x50   : > { %s1551_s13 = smul.u32 40, %s304_s22  ;;  %s1925_s24 = smov 640  }
  0x51   : > { %1563 = sst [smem:[#allocation13]] (%p2021_p5), %s1925_s24  ;;  %s314_s21 = scalar_lea.hbm %s2234_s0, %s1421_s12 }
  0x52   : > { %s1562_s23 = scalar_select %p2021_p5, [#allocation0], [#allocation14] }
  0x53   : > { %s308_s1 = scalar_lea.vmem [#allocation2], %s1551_s13  ;;  %s1926_s2 = smov 320  }
  0x54   : > { %s319_s26 = sld [smem:[%s1562_s23]]   ;;  %s327_s10 = sshll.u32 %s308_s1, 4  ;;  %s328_s10 = int_to_ptr.vmem [resolvable:$true] %s327_s10 }
  0x55   : > { %1564 = sst [smem:[#allocation13 + $0x1]] (%p2021_p5), %s1926_s2  ;;  %s1927_s4 = smov 5  }
  0x56   : > { %1565 = sst [smem:[#allocation13 + $0x2]] (%p2021_p5), %s1927_s4  ;;  %s1928_s6 = smov 64  }
  0x57   : > { %1566 = sst [smem:[#allocation13 + $0x3]] (%p2021_p5), %s1928_s6  ;;  %s1929_s24 = smov 4  }
  0x58   : > { %1567 = sst [smem:[#allocation13 + $0x4]] (%p2021_p5), %s1928_s6  ;;  %s305_s13 = scalar_lea.sflag [#allocation3], %s304_s22 }
  0x59   : > { %1568 = sst [smem:[#allocation13 + $0x5]] (%p2021_p5), %s1929_s24  ;;  %s1930_s25 = smov 131072  }
  0x5a   : > { %s1350_s12 = sshll.u32 %s319_s26, 26 }
  0x5b   : > { %s1351_s23 = sadd.s32 134217728, %s1350_s12 }
  0x5c   : > { %1569 = dma.general (%p2021_p5), %s314_s21, 640, %s328_s10, %s305_s13, %s1930_s25, [#allocation13], %s1351_s23, 0  }
  0x5d PF: > { %352 = sbr.rel (%p2042_p13) target bundleno = 1181 (0x49d), region = 52  ;;  %s2124_s2 = sand.u32 (!%p2042_p13), 1, %s1907_s28  }
  0x5e   : > { %s1552_s4 = smul.u32 (!%p2042_p13), 40, %s2124_s2  ;;  %s355_s6 = scalar_lea.sflag (!%p2042_p13), [#allocation3], %s2124_s2 }
  0x60   : > { %s2128_s20 = scalar_lea.vmem (!%p2042_p13), [#allocation2], %s1552_s4 }
  0x62   : > { %1886 = dma.done.wait (%p2027_p6), %s355_s6, 640  }
  0x63   : > { %1888 = vsyncadd (%p2027_p6), %s355_s6, 4294966656  ;;  %p2259_p5 = scmp.eq.s32.totalorder %s2003_s9, 0 }
  0x65   : > { %1890 = dma.done.wait (%p2259_p5), [#allocation6], 4096   ;;  %p2260_p13 = pmov %p2259_p5 }
  0x66   : > { %p2261_p2 = pmov %p2259_p5 }
  0x67   : > { %1892 = vsyncadd (%p2260_p13), [#allocation6], 4294963200 }
  0x68   : > { %1894 = dma.done.wait (%p2261_p2), [#allocation9], 2048   ;;  %p2262_p0 = pmov %p2261_p2 }
  0x69   : > { %v1931_v0 = vmov 0   ;;  %v1658_v1 = vld [vmem:[#allocation5 + $0x74] ss:$8 sps:$4 sm:$0xff]   ;;  %v1660_v2 = vld [vmem:[#allocation5 + $0x70] ss:$8 sps:$4 sm:$0xff]   ;;  %v1684_v19 = vld [vmem:[%s2128_s20 + $0x10] sm:$0xff]  }
  0x6a   : > { %1896 = vsyncadd (%p2262_p0), [#allocation9], 4294965248  ;;  %578 = vmatprep.mubr.bf16.mxu0 %v1931_v0  ;;  %546 = vmatprep.subr.bf16.mxu0 %v1658_v1  ;;  %v1661_v3 = vld [vmem:[#allocation5 + $0x64] ss:$8 sps:$4 sm:$0xff]   ;;  %v1663_v4 = vld [vmem:[#allocation5 + $0x60] ss:$8 sps:$4 sm:$0xff]  }
  0x6b   : > { %547 = vmatpush1.bf16.msra.mxu0 %v1660_v2  ;;  %v1664_v5 = vld [vmem:[#allocation5 + $0x54] ss:$8 sps:$4 sm:$0xff]   ;;  %v1666_v6 = vld [vmem:[#allocation5 + $0x50] ss:$8 sps:$4 sm:$0xff]   ;;  %v1667_v7 = vld [vmem:[#allocation5 + $0x44] ss:$8 sps:$4 sm:$0xff]  }
  0x6c   : > { %548 = vmatprep.subr.bf16.mxu0 %v1661_v3  ;;  %v1669_v8 = vld [vmem:[#allocation5 + $0x40] ss:$8 sps:$4 sm:$0xff]   ;;  %v1670_v9 = vld [vmem:[#allocation5 + $0x34] ss:$8 sps:$4 sm:$0xff]   ;;  %v1672_v10 = vld [vmem:[#allocation5 + $0x30] ss:$8 sps:$4 sm:$0xff]  }
  0x6d   : > { %v1673_v11 = vld [vmem:[#allocation5 + $0x24] ss:$8 sps:$4 sm:$0xff]   ;;  %v1675_v12 = vld [vmem:[#allocation5 + $0x20] ss:$8 sps:$4 sm:$0xff]   ;;  %v1676_v13 = vld [vmem:[#allocation5 + $0x14] ss:$8 sps:$4 sm:$0xff]  }
  0x6e   : > { %v1678_v14 = vld [vmem:[#allocation5 + $0x10] ss:$8 sps:$4 sm:$0xff]   ;;  %v1679_v15 = vld [vmem:[#allocation5 + $0x4] ss:$8 sps:$4 sm:$0xff]   ;;  %v1681_v16 = vld [vmem:[#allocation5] ss:$8 sps:$4 sm:$0xff]  }
  0x6f   : > { %549 = vmatpush1.bf16.msra.mxu0 %v1663_v4  ;;  %v1682_v17 = vld [vmem:[%s2128_s20] sm:$0xff]   ;;  %v1683_v18 = vld [vmem:[%s2128_s20 + $0x8] sm:$0xff]   ;;  %v1685_v20 = vld [vmem:[%s2128_s20 + $0x18] sm:$0xff]   ;;  %v1932_v38 = vmov 0.0   ;;  %vm1933_vm0 = vmmov 0   ;;  %s1553_s1 = smul.u32 20, %s2124_s2 }
  0x70   : > { %550 = vmatprep.subr.bf16.mxu0 %v1664_v5  ;;  %v1686_v21 = vld [vmem:[%s2128_s20 + $0x20] sm:$0xff]   ;;  %v1691_v26 = vld [vmem:[#allocation7 + $0x68] sm:$0xff]   ;;  %v1693_v28 = vld [vmem:[#allocation7 + $0x60] sm:$0xff]   ;;  %s1427_s24 = smul.u32 320, %s2003_s9  ;;  %s1218_s4 = scalar_lea.sflag [#allocation4], %s2124_s2 }
  0x71   : > { %v1687_v22 = vld [vmem:[#allocation7 + $0x78] sm:$0xff]   ;;  %v1689_v24 = vld [vmem:[#allocation7 + $0x70] sm:$0xff]   ;;  %v1692_v27 = vld [vmem:[#allocation7 + $0x28] sm:$0xff]   ;;  %s406_s10 = scalar_lea.vmem [#allocation11], %s1553_s1  ;;  %p2263_p9 = scmp.ne.s32.totalorder %s2251_s17, 0 }
  0x72   : > { %v1688_v23 = vld [vmem:[#allocation7 + $0x38] sm:$0xff]   ;;  %1439 = vmatprep.subr.bf16.mxu1 %v1687_v22  ;;  %v1690_v25 = vld [vmem:[#allocation7 + $0x30] sm:$0xff]   ;;  %v1694_v29 = vld [vmem:[#allocation7 + $0x20] sm:$0xff]   ;;  %s1231_s12 = sshll.u32 %s406_s10, 4  ;;  %s2189_s25 = scalar_lea.hbm %s2242_s8, %s1427_s24  ;;  %s2191_s12 = int_to_ptr.vmem [resolvable:$true] %s1231_s12 }
  0x73   : > { %551 = vmatpush1.bf16.msra.mxu0 %v1666_v6  ;;  %1440 = vmatpush3.bf16.msra.mxu1 %v1688_v23  ;;  %v1695_v30 = vld [vmem:[#allocation7 + $0x58] sm:$0xff]   ;;  %v1697_v32 = vld [vmem:[#allocation7 + $0x50] sm:$0xff]   ;;  %v1699_v34 = vld [vmem:[#allocation7 + $0x48] sm:$0xff]   ;;  %s1843_s6 = scalar_lea.vmem %s2191_s12, 320  ;;  %s1934_s9 = smov [#allocation11]  }
  0x74   : > { %552 = vmatprep.subr.bf16.mxu0 %v1667_v7  ;;  %1441 = vmatprep.subr.bf16.mxu1 %v1689_v24  ;;  %v1696_v31 = vld [vmem:[#allocation7 + $0x18] sm:$0xff]   ;;  %v1698_v33 = vld [vmem:[#allocation7 + $0x10] sm:$0xff]   ;;  %v1700_v35 = vld [vmem:[#allocation7 + $0x8] sm:$0xff]   ;;  %p1844_p6 = scmp.ne.s32.totalorder %s2191_s12, %s1843_s6  ;;  %s1847_s20 = sshll.u32 %s1934_s9, 4  ;;  %s1848_s20 = int_to_ptr.vmem [resolvable:$false] %s1847_s20 }
  0x75   : > { %v1701_v36 = vld [vmem:[#allocation7 + $0x40] sm:$0xff]   ;;  %s1849_s15 = scalar_lea.vmem %s1848_s20, 640  ;;  %p1850_p4 = scmp.lt.s32.totalorder %s2191_s12, %s1848_s20 }
  0x76   : > { %v1702_v37 = vld [vmem:[#allocation7] sm:$0xff]   ;;  %p1845_p12 = pnand %p1844_p6, %p2263_p9  ;;  %p1851_p8 = scmp.lt.s32.totalorder %s1849_s15, %s1843_s6 }
  0x77   : > { %553 = vmatpush1.bf16.msra.mxu0 %v1669_v8  ;;  %1442 = vmatpush3.bf16.msra.mxu1 %v1690_v25 }
  0x78   : > { %554 = vmatprep.subr.bf16.mxu0 %v1670_v9  ;;  %1443 = vmatprep.subr.bf16.mxu1 %v1691_v26  ;;  %p1846_p11 = pneg %p1845_p12  ;;  %p1852_p10 = por %p1851_p8, %p1850_p4 }
  0x7a   : > { %p1853_p1 = pnand %p1852_p10, %p1846_p11 }
  0x7b   : > { %555 = vmatpush1.bf16.msra.mxu0 %v1672_v10  ;;  %1444 = vmatpush3.bf16.msra.mxu1 %v1692_v27 }
  0x7c   : > { %556 = vmatprep.subr.bf16.mxu0 %v1673_v11  ;;  %1445 = vmatprep.subr.bf16.mxu1 %v1693_v28 }
  0x7f   : > { %557 = vmatpush1.bf16.msra.mxu0 %v1675_v12  ;;  %1446 = vmatpush3.bf16.msra.mxu1 %v1694_v29 }
  0x80   : > { %558 = vmatprep.subr.bf16.mxu0 %v1676_v13  ;;  %1447 = vmatprep.subr.bf16.mxu1 %v1695_v30 }
  0x83   : > { %559 = vmatpush1.bf16.msra.mxu0 %v1678_v14  ;;  %1448 = vmatpush3.bf16.msra.mxu1 %v1696_v31 }
  0x84   : > { %560 = vmatprep.subr.bf16.mxu0 %v1679_v15  ;;  %1449 = vmatprep.subr.bf16.mxu1 %v1697_v32 }
  0x87   : > { %561 = vmatpush1.bf16.msra.mxu0 %v1681_v16  ;;  %1450 = vmatpush3.bf16.msra.mxu1 %v1698_v33 }
  0x88   : > { %1451 = vmatprep.subr.bf16.mxu1 %v1699_v34  ;;  %1523 = vmatprep.subr.bf16.mxu0 %v1932_v38 }
  0x8a   : > { %579 = vmatmul.mubr.bf16.vlgmr.msra.gmra.mxu0 %v1682_v17 }
  0x8b   : > { %588 = vmatprep.mubr.bf16.mxu0 %v1931_v0  ;;  %1452 = vmatpush3.bf16.msra.mxu1 %v1700_v35 }
  0x8c   : > { %1453 = vmatprep.subr.bf16.mxu1 %v1701_v36 }
  0x8f   : > { %1454 = vmatpush3.bf16.msra.mxu1 %v1702_v37 }
  0x90   : > { %1495 = vmatprep.subr.bf16.mxu1 %v1932_v38 }
  0x92   : > { %589 = vmatmul.mubr.bf16.gmra.mxu0 %v1683_v18 }
  0x93   : > { %598 = vmatprep.mubr.bf16.mxu0 %v1931_v0 }
  0x9a   : > { %599 = vmatmul.mubr.bf16.gmra.mxu0 %v1684_v19 }
  0x9b   : > { %608 = vmatprep.mubr.bf16.mxu0 %v1931_v0 }
  0xa2   : > { %609 = vmatmul.mubr.bf16.gmra.mxu0 %v1685_v20 }
  0xa3   : > { %618 = vmatprep.mubr.bf16.mxu0 %v1931_v0 }
  0xaa   : > { %619 = vmatmul.mubr.bf16.gmra.mxu0 %v1686_v21 }
  0xab   : > { %1539 = vmatprep.mubr.msk.bf16.mxu0 %vm1933_vm0, %v1932_v38 }
 0x14a   : > { %v580_v39 = vpop.f32.mrf.mxu0 }
 0x14c   : > { %v582_v40 = vpop.f32.mrf.mxu0 }
 0x14e   : > { %v584_v41 = vpop.f32.mrf.mxu0 }
 0x150   : > { %v586_v42 = vpop.f32.mrf.mxu0 }
 0x152   : > { %v590_v43 = vpop.f32.mrf.mxu0 }
 0x154   : > { %v592_v44 = vpop.f32.mrf.mxu0 }
 0x156   : > { %v594_v45 = vpop.f32.mrf.mxu0 }
 0x158   : > { %v596_v46 = vpop.f32.mrf.mxu0 }
 0x15a   : > { %v600_v47 = vpop.f32.mrf.mxu0 }
 0x15c   : > { %v602_v48 = vpop.f32.mrf.mxu0 }
 0x15e   : > { %v604_v49 = vpop.f32.mrf.mxu0 }
 0x15f   : > { %v629_v51 = vmul.f32 %v604_v49, %v580_v39  ;;  %v644_v52 = vmul.f32 %v604_v49, %v582_v40 }
 0x160   : > { %v606_v50 = vpop.f32.mrf.mxu0 }
 0x161   : > { %v634_v53 = vmul.f32 %v606_v50, %v582_v40  ;;  %v649_v54 = vmul.f32 %v606_v50, %v580_v39 }
 0x162   : > { %v610_v55 = vpop.f32.mrf.mxu0 }
 0x163   : > { %v639_v56 = vadd.f32 %v634_v53, %v629_v51  ;;  %v654_v57 = vsub.f32 %v644_v52, %v649_v54  ;;  %v630_v58 = vmul.f32 %v610_v55, %v584_v41  ;;  %v645_v59 = vmul.f32 %v610_v55, %v586_v42  ;;  %v1703_v54 = vld [vmem:[#allocation8 + $0x38] sm:$0xff]  }
 0x164   : > { %v612_v60 = vpop.f32.mrf.mxu0 }
 0x165   : > { %v659_v61 = vmul.f32 %v639_v56, %v639_v56  ;;  %v664_v62 = vmul.f32 %v654_v57, %v654_v57  ;;  %v635_v63 = vmul.f32 %v612_v60, %v586_v42  ;;  %v650_v0 = vmul.f32 %v612_v60, %v584_v41 }
 0x166   : > { %v614_v1 = vpop.f32.mrf.mxu0 }
 0x167   : > { %v669_v2 = vadd.f32 %v664_v62, %v659_v61  ;;  %v640_v3 = vadd.f32 %v635_v63, %v630_v58  ;;  %v655_v4 = vsub.f32 %v645_v59, %v650_v0  ;;  %v631_v5 = vmul.f32 %v614_v1, %v590_v43  ;;  %v1704_v58 = vld [vmem:[#allocation8 + $0x30] sm:$0xff]  }
 0x168   : > { %v616_v6 = vpop.f32.mrf.mxu0  ;;  %v646_v11 = vmul.f32 %v614_v1, %v592_v44 }
 0x169   : > { %v674_v7 = vadd.f32 1e-06, %v669_v2  ;;  %v660_v8 = vmul.f32 %v640_v3, %v640_v3  ;;  %v665_v9 = vmul.f32 %v655_v4, %v655_v4  ;;  %v636_v10 = vmul.f32 %v616_v6, %v592_v44 }
 0x16a   : > { %v651_v12 = vmul.f32 %v616_v6, %v590_v43  ;;  %v620_v13 = vpop.f32.mrf.mxu0 }
 0x16b   : > { %v670_v14 = vadd.f32 %v665_v9, %v660_v8  ;;  %v641_v15 = vadd.f32 %v636_v10, %v631_v5  ;;  %1719 = vrsqrt.f32 %v674_v7  ;;  %v632_v17 = vmul.f32 %v620_v13, %v594_v45  ;;  %v1707_v7 = vld [vmem:[#allocation8 + $0x18] sm:$0xff]   ;;  %v1708_v8 = vld [vmem:[#allocation8 + $0x10] sm:$0xff]   ;;  %v1709_v9 = vld [vmem:[#allocation8 + $0x8] sm:$0xff]  }
 0x16c   : > { %v656_v16 = vsub.f32 %v646_v11, %v651_v12  ;;  %v647_v18 = vmul.f32 %v620_v13, %v596_v46  ;;  %v622_v19 = vpop.f32.mrf.mxu0  ;;  %v1710_v10 = vld [vmem:[#allocation8] sm:$0xff]   ;;  %v1711_v11 = vld [vmem:[#allocation10 + $0x38] sm:$0xff]   ;;  %v1712_v12 = vld [vmem:[#allocation10 + $0x30] sm:$0xff]  }
 0x16d   : > { %v675_v20 = vadd.f32 1e-06, %v670_v14  ;;  %v661_v21 = vmul.f32 %v641_v15, %v641_v15  ;;  %v637_v22 = vmul.f32 %v622_v19, %v596_v46  ;;  %v652_v23 = vmul.f32 %v622_v19, %v594_v45  ;;  %1524 = vmatpush3.bf16.msra.mxu0 %v1711_v11  ;;  %v1713_v13 = vld [vmem:[#allocation10 + $0x28] sm:$0xff]   ;;  %v1714_v14 = vld [vmem:[#allocation10 + $0x20] sm:$0xff]  }
 0x16e   : > { %v666_v24 = vmul.f32 %v656_v16, %v656_v16  ;;  %v624_v25 = vpop.f32.mrf.mxu0  ;;  %1525 = vmatprep.subr.bf16.mxu0 %v1932_v38 }
 0x16f   : > { %1721 = vrsqrt.f32 %v675_v20  ;;  %v642_v26 = vadd.f32 %v637_v22, %v632_v17  ;;  %v657_v27 = vsub.f32 %v647_v18, %v652_v23  ;;  %v633_v29 = vmul.f32 %v624_v25, %v600_v47  ;;  %v1378_v20 = vld [vmem:[%s2237_s3] ss:$0 sm:$0xff] }
 0x170   : > { %v671_v28 = vadd.f32 %v666_v24, %v661_v21  ;;  %v648_v30 = vmul.f32 %v624_v25, %v602_v48  ;;  %v626_v31 = vpop.f32.mrf.mxu0 }
 0x171   : > { %v662_v32 = vmul.f32 %v642_v26, %v642_v26  ;;  %v667_v33 = vmul.f32 %v657_v27, %v657_v27  ;;  %v638_v34 = vmul.f32 %v626_v31, %v602_v48  ;;  %v653_v35 = vmul.f32 %v626_v31, %v600_v47  ;;  %1526 = vmatpush3.bf16.msra.mxu0 %v1712_v12 }
 0x172   : > { %v676_v36 = vadd.f32 1e-06, %v671_v28  ;;  %1527 = vmatprep.subr.bf16.mxu0 %v1932_v38 }
 0x173   : > { %v672_v37 = vadd.f32 %v667_v33, %v662_v32  ;;  %v643_v39 = vadd.f32 %v638_v34, %v633_v29  ;;  %v658_v40 = vsub.f32 %v648_v30, %v653_v35 }
 0x174   : > { %1723 = vrsqrt.f32 %v676_v36 }
 0x175   : > { %v677_v41 = vadd.f32 1e-06, %v672_v37  ;;  %v663_v42 = vmul.f32 %v643_v39, %v643_v39  ;;  %v668_v43 = vmul.f32 %v658_v40, %v658_v40  ;;  %1528 = vmatpush3.bf16.msra.mxu0 %v1713_v13  ;;  %v1404_v13 = vld [vmem:[%s2241_s7] ss:$0 sm:$0xff] }
 0x176   : > { %1529 = vmatprep.subr.bf16.mxu0 %v1932_v38 }
 0x177   : > { %1725 = vrsqrt.f32 %v677_v41  ;;  %v673_v44 = vadd.f32 %v668_v43, %v663_v42 }
 0x178   : > { %v1720_v45 = vpop.eup %1719 }
 0x179   : > { %v678_v46 = vadd.f32 1e-06, %v673_v44  ;;  %v684_v50 = vmul.f32 %v1720_v45, %v639_v56  ;;  %v689_v52 = vmul.f32 %v1720_v45, %v654_v57  ;;  %v1705_v57 = vld [vmem:[#allocation8 + $0x28] sm:$0xff]   ;;  %1530 = vmatpush3.bf16.msra.mxu0 %v1714_v14 }
 0x17a   : > { %1531 = vmatprep.subr.bf16.mxu0 %v1932_v38 }
 0x17b   : > { %1727 = vrsqrt.f32 %v678_v46 }
 0x17c   : > { %v1722_v49 = vpop.eup %1721 }
 0x17d   : > { %v685_v51 = vmul.f32 %v1722_v49, %v640_v3  ;;  %v690_v53 = vmul.f32 %v1722_v49, %v655_v4  ;;  %v1706_v4 = vld [vmem:[#allocation8 + $0x20] sm:$0xff]  }
 0x17f   : > { %v695_v48 = vpack.c.bf16 %v690_v53, %v689_v52  ;;  %v694_v47 = vpack.c.bf16 %v685_v51, %v684_v50  ;;  %v1717_v51 = vld [vmem:[#allocation10 + $0x8] sm:$0xff]   ;;  %v1718_v52 = vld [vmem:[#allocation10] sm:$0xff]   ;;  %v1395_v53 = vld [vmem:[%s2239_s5] ss:$0 sm:$0xff] }
 0x181   : > { %867 = vmatprep.mubr.bf16.mxu1 %v695_v48  ;;  %v1724_v55 = vpop.eup %1723 }
 0x182   : > { %868 = vmatmul.mubr.bf16.vlgmr.msra.gmra.mxu1 %v694_v47  ;;  %v686_v60 = vmul.f32 %v1724_v55, %v641_v15  ;;  %v691_v61 = vmul.f32 %v1724_v55, %v656_v16  ;;  %v1715_v15 = vld [vmem:[#allocation10 + $0x18] sm:$0xff]   ;;  %v1716_v16 = vld [vmem:[#allocation10 + $0x10] sm:$0xff]  }
 0x183   : > { %1496 = vmatpush3.bf16.msra.mxu1 %v1703_v54  ;;  %1532 = vmatpush3.bf16.msra.mxu0 %v1715_v15 }
 0x184   : > { %v1726_v59 = vpop.eup %1725  ;;  %1497 = vmatprep.subr.bf16.mxu1 %v1932_v38  ;;  %1533 = vmatprep.subr.bf16.mxu0 %v1932_v38 }
 0x185   : > { %v687_v62 = vmul.f32 %v1726_v59, %v642_v26  ;;  %v692_v63 = vmul.f32 %v1726_v59, %v657_v27 }
 0x187   : > { %v697_v0 = vpack.c.bf16 %v692_v63, %v691_v61  ;;  %v696_v56 = vpack.c.bf16 %v687_v62, %v686_v60  ;;  %1498 = vmatpush3.bf16.msra.mxu1 %v1704_v58  ;;  %1534 = vmatpush3.bf16.msra.mxu0 %v1716_v16 }
 0x188   : > { %v1728_v1 = vpop.eup %1727  ;;  %1499 = vmatprep.subr.bf16.mxu1 %v1932_v38  ;;  %1535 = vmatprep.subr.bf16.mxu0 %v1932_v38 }
 0x189   : > { %875 = vmatprep.mubr.bf16.mxu1 %v697_v0  ;;  %v693_v2 = vmul.f32 %v1728_v1, %v658_v40  ;;  %v688_v5 = vmul.f32 %v1728_v1, %v643_v39 }
 0x18a   : > { %876 = vmatmul.mubr.bf16.gmra.mxu1 %v696_v56 }
 0x18b   : > { %v699_v3 = vpack.c.bf16 %v693_v2, %v693_v2  ;;  %1500 = vmatpush3.bf16.msra.mxu1 %v1705_v57  ;;  %v698_v6 = vpack.c.bf16 %v688_v5, %v688_v5  ;;  %1536 = vmatpush3.bf16.msra.mxu0 %v1717_v51 }
 0x18c   : > { %1501 = vmatprep.subr.bf16.mxu1 %v1932_v38  ;;  %1537 = vmatprep.subr.bf16.mxu0 %v1932_v38 }
 0x18d   : > { %883 = vmatprep.mubr.bf16.mxu1 %v699_v3 }
 0x18f   : > { %1502 = vmatpush3.bf16.msra.mxu1 %v1706_v4  ;;  %1538 = vmatpush3.bf16.msra.mxu0 %v1718_v52 }
 0x190   : > { %1503 = vmatprep.subr.bf16.mxu1 %v1932_v38 }
 0x192   : > { %884 = vmatmul.mubr.bf16.gmra.mxu1 %v698_v6 }
 0x193   : > { %1504 = vmatpush3.bf16.msra.mxu1 %v1707_v7  ;;  %1511 = vmatprep.mubr.msk.bf16.mxu1 %vm1933_vm0, %v1932_v38 }
 0x194   : > { %1505 = vmatprep.subr.bf16.mxu1 %v1932_v38 }
 0x197   : > { %1506 = vmatpush3.bf16.msra.mxu1 %v1708_v8 }
 0x198   : > { %1507 = vmatprep.subr.bf16.mxu1 %v1932_v38 }
 0x19b   : > { %1508 = vmatpush3.bf16.msra.mxu1 %v1709_v9 }
 0x19c   : > { %1509 = vmatprep.subr.bf16.mxu1 %v1932_v38 }
 0x19f   : > { %1510 = vmatpush3.bf16.msra.mxu1 %v1710_v10 }
 0x242   : > { %v1455_v17 = vpop.f32.mrf.mxu1 }
 0x244   : > { %v1456_v18 = vpop.f32.mrf.mxu1 }
 0x245   : > { %v1457_v19 = vadd.f32 %v1456_v18, %v1455_v17 }
 0x246   : > { %v1458_v21 = vpop.f32.mrf.mxu1 }
 0x247   : > { %v870_v23 = vadd.f32 %v1457_v19, %v1378_v20 }
 0x248   : > { %v1459_v22 = vpop.f32.mrf.mxu1 }
 0x249   : > { %v1460_v24 = vadd.f32 %v1459_v22, %v1458_v21  ;;  %v891_v28 = vmax.f32 %v870_v23, 0.0 }
 0x24a   : > { %v1461_v25 = vpop.f32.mrf.mxu1 }
 0x24b   : > { %v873_v26 = vadd.f32 %v1460_v24, %v1378_v20 }
 0x24c   : > { %v1462_v27 = vpop.f32.mrf.mxu1 }
 0x24d   : > { %v892_v29 = vmax.f32 %v873_v26, 0.0  ;;  %v1463_v30 = vadd.f32 %v1462_v27, %v1461_v25 }
 0x24e   : > { %v1464_v31 = vpop.f32.mrf.mxu1 }
 0x24f   : > { %v896_v32 = vpack.c.bf16 %v892_v29, %v891_v28  ;;  %v878_v34 = vadd.f32 %v1463_v30, %v1378_v20 }
 0x250   : > { %v1465_v33 = vpop.f32.mrf.mxu1 }
 0x251   : > { %v1466_v35 = vadd.f32 %v1465_v33, %v1464_v31  ;;  %1512 = vmatmul.mubr.bf16.vlgmr.msra.gmra.mxu1 %v896_v32  ;;  %v893_v40 = vmax.f32 %v878_v34, 0.0 }
 0x252   : > { %v1467_v36 = vpop.f32.mrf.mxu1  ;;  %1515 = vmatprep.mubr.msk.bf16.mxu1 %vm1933_vm0, %v1932_v38 }
 0x253   : > { %v881_v37 = vadd.f32 %v1466_v35, %v1378_v20 }
 0x254   : > { %v1468_v39 = vpop.f32.mrf.mxu1 }
 0x255   : > { %v894_v41 = vmax.f32 %v881_v37, 0.0  ;;  %v1469_v42 = vadd.f32 %v1468_v39, %v1467_v36 }
 0x256   : > { %v1470_v43 = vpop.f32.mrf.mxu1 }
 0x257   : > { %v886_v44 = vadd.f32 %v1469_v42, %v1378_v20  ;;  %v897_v45 = vpack.c.bf16 %v894_v41, %v893_v40 }
 0x258   : > { %v1471_v46 = vpop.f32.mrf.mxu1 }
 0x259   : > { %1516 = vmatmul.mubr.bf16.gmra.mxu1 %v897_v45  ;;  %v895_v49 = vmax.f32 %v886_v44, 0.0 }
 0x25a   : > { %1519 = vmatprep.mubr.msk.bf16.mxu1 %vm1933_vm0, %v1932_v38 }
 0x25b   : > { %v898_v50 = vpack.c.bf16 %v895_v49, %v895_v49 }
 0x261   : > { %1520 = vmatmul.mubr.bf16.gmra.mxu1 %v898_v50 }
 0x311   : > { %v1004_v48 = vpop.f32.mrf.mxu1 }
 0x312   : > { %v1005_v54 = vadd.f32 %v1395_v53, %v1004_v48 }
 0x313   : > { %v1513_v47 = vpop.f32.mrf.mxu1 }
 0x314   : > { %v1026_v60 = vmax.f32 %v1005_v54, 0.0 }
 0x315   : > { %v1007_v55 = vpop.f32.mrf.mxu1 }
 0x316   : > { %v1008_v58 = vadd.f32 %v1395_v53, %v1007_v55 }
 0x317   : > { %v1514_v59 = vpop.f32.mrf.mxu1 }
 0x318   : > { %v1027_v61 = vmax.f32 %v1008_v58, 0.0 }
 0x319   : > { %v1012_v62 = vpop.f32.mrf.mxu1 }
 0x31a   : > { %v1031_v63 = vpack.c.bf16 %v1027_v61, %v1026_v60  ;;  %v1013_v56 = vadd.f32 %v1395_v53, %v1012_v62 }
 0x31b   : > { %v1517_v0 = vpop.f32.mrf.mxu1 }
 0x31c   : > { %1540 = vmatmul.mubr.bf16.vlgmr.msra.gmra.mxu0 %v1031_v63  ;;  %v1028_v3 = vmax.f32 %v1013_v56, 0.0 }
 0x31d   : > { %v1015_v57 = vpop.f32.mrf.mxu1  ;;  %1543 = vmatprep.mubr.msk.bf16.mxu0 %vm1933_vm0, %v1932_v38 }
 0x31e   : > { %v1016_v1 = vadd.f32 %v1395_v53, %v1015_v57 }
 0x31f   : > { %v1518_v2 = vpop.f32.mrf.mxu1 }
 0x320   : > { %v1029_v4 = vmax.f32 %v1016_v1, 0.0 }
 0x321   : > { %v1020_v5 = vpop.f32.mrf.mxu1 }
 0x322   : > { %v1032_v6 = vpack.c.bf16 %v1029_v4, %v1028_v3  ;;  %v1021_v7 = vadd.f32 %v1395_v53, %v1020_v5 }
 0x323   : > { %v1521_v8 = vpop.f32.mrf.mxu1 }
 0x324   : > { %1544 = vmatmul.mubr.bf16.gmra.mxu0 %v1032_v6  ;;  %v1030_v10 = vmax.f32 %v1021_v7, 0.0 }
 0x325   : > { %v1023_v9 = vpop.f32.mrf.mxu1  ;;  %1547 = vmatprep.mubr.msk.bf16.mxu0 %vm1933_vm0, %v1932_v38 }
 0x326   : > { %v1033_v12 = vpack.c.bf16 %v1030_v10, %v1030_v10 }
 0x327   : > { %v1522_v11 = vpop.f32.mrf.mxu1 }
 0x32c   : > { %1548 = vmatmul.mubr.bf16.gmra.mxu0 %v1033_v12 }
 0x3dc   : > { %v1139_v14 = vpop.f32.mrf.mxu0 }
 0x3dd   : > { %v1140_v15 = vadd.f32 %v1404_v13, %v1139_v14 }
 0x3de   : > { %v1541_v16 = vpop.f32.mrf.mxu0 }
 0x3df   : > { %v1161_v17 = vmul.f32 %v1140_v15, %v1140_v15 }
 0x3e0   : > { %v1142_v18 = vpop.f32.mrf.mxu0 }
 0x3e1   : > { %v1143_v19 = vadd.f32 %v1404_v13, %v1142_v18  ;;  %1166 = vadd.xlane.f32.xlu0 %v1161_v17 }
 0x3e2   : > { %v1542_v20 = vpop.f32.mrf.mxu0 }
 0x3e3   : > { %v1162_v21 = vmul.f32 %v1143_v19, %v1143_v19 }
 0x3e4   : > { %v1147_v22 = vpop.f32.mrf.mxu0 }
 0x3e5   : > { %v1148_v23 = vadd.f32 %v1404_v13, %v1147_v22  ;;  %1168 = vadd.xlane.f32.xlu0 %v1162_v21 }
 0x3e6   : > { %v1545_v38 = vpop.f32.mrf.mxu0 }
 0x3e7   : > { %v1163_v24 = vmul.f32 %v1148_v23, %v1148_v23 }
 0x3e8   : > { %v1150_v25 = vpop.f32.mrf.mxu0 }
 0x3e9   : > { %v1151_v26 = vadd.f32 %v1404_v13, %v1150_v25  ;;  %1170 = vadd.xlane.f32.xlu1 %v1163_v24 }
 0x3ea   : > { %v1546_v27 = vpop.f32.mrf.mxu0 }
 0x3eb   : > { %v1164_v28 = vmul.f32 %v1151_v26, %v1151_v26 }
 0x3ec   : > { %v1155_v29 = vpop.f32.mrf.mxu0 }
 0x3ed   : > { %v1156_v30 = vadd.f32 %v1404_v13, %v1155_v29  ;;  %1172 = vadd.xlane.f32.xlu1 %v1164_v28 }
 0x3ee   : > { %v1549_v31 = vpop.f32.mrf.mxu0 }
 0x3ef   : > { %v1165_v32 = vmul.f32 %v1156_v30, %v1156_v30 }
 0x3f0   : > { %v1158_v33 = vpop.f32.mrf.mxu0 }
 0x3f1   : > { %1174 = vadd.xlane.f32.xlu0 %v1165_v32 }
 0x3f2   : > { %v1550_v34 = vpop.f32.mrf.mxu0 }
 0x46a   : > { %v1167_v35 = vpop.xlane.xlu0 %1166 }
 0x46b   : > { %v1176_v36 = vadd.f32 1e-12, %v1167_v35 }
 0x46d   : > { %1729 = vrsqrt.f32 %v1176_v36 }
 0x46e   : > { %v1169_v37 = vpop.xlane.xlu0 %1168 }
 0x46f   : > { %v1177_v39 = vadd.f32 1e-12, %v1169_v37 }
 0x471   : > { %1731 = vrsqrt.f32 %v1177_v39 }
 0x472   : > { %v1171_v40 = vpop.xlane.xlu1 %1170 }
 0x473   : > { %v1178_v41 = vadd.f32 1e-12, %v1171_v40 }
 0x475   : > { %1733 = vrsqrt.f32 %v1178_v41 }
 0x476   : > { %v1173_v42 = vpop.xlane.xlu1 %1172 }
 0x477   : > { %v1179_v43 = vadd.f32 1e-12, %v1173_v42 }
 0x479   : > { %1735 = vrsqrt.f32 %v1179_v43 }
 0x47a   : > { %v1175_v44 = vpop.xlane.xlu0 %1174  ;;  %v1730_v46 = vpop.eup %1729 }
 0x47b   : > { %v1180_v45 = vadd.f32 1e-12, %v1175_v44  ;;  %v1186_v50 = vmul.f32 %v1730_v46, %v1140_v15 }
 0x47d   : > { %1737 = vrsqrt.f32 %v1180_v45 }
 0x47e   : > { %v1732_v49 = vpop.eup %1731 }
 0x47f   : > { %v1187_v51 = vmul.f32 %v1732_v49, %v1143_v19 }
 0x481   : > { %v1431_v52 = vpack.c.bf16 %v1187_v51, %v1186_v50 }
 0x482   : > { %v1734_v53 = vpop.eup %1733 }
 0x483   : > { %1432 = vst [vmem:[%s406_s10] sm:$0xff] %v1431_v52   ;;  %v1188_v47 = vmul.f32 %v1734_v53, %v1148_v23 }
 0x486   : > { %v1736_v48 = vpop.eup %1735 }
 0x487   : > { %v1189_v54 = vmul.f32 %v1736_v48, %v1151_v26 }
 0x489   : > { %v1436_v55 = vpack.c.bf16 %v1189_v54, %v1188_v47 }
 0x48a   : > { %v1738_v58 = vpop.eup %1737 }
 0x48b   : > { %v1190_v59 = vmul.f32 %v1738_v58, %v1156_v30  ;;  %1438 = vst [vmem:[%s406_s10 + $0x8] sm:$0xff] %v1436_v55  }
 0x48d   : > { %v1426_v60 = vpack.c.bf16 %v1190_v59, %v1190_v59 }
 0x48f   : > { %1216 = vst [vmem:[%s406_s10 + $0x10] sm:$0xf] %v1426_v60 }
 0x490   : > { %1856 = shalt.err (!%p1853_p1)
}
 0x491   : > { %s1857_s16 = scalar_lea.hbm %s2189_s25, 320  ;;  %s1861_s21 = scalar_lea.hbm %s2242_s8, 640 }
 0x492   : > { %p1858_p3 = scmp.ne.s32.totalorder %s2189_s25, %s1857_s16  ;;  %p1862_p2 = scmp.lt.s32.totalorder %s2189_s25, %s2242_s8 }
 0x493   : > { %p1863_p0 = scmp.lt.s32.totalorder %s1861_s21, %s1857_s16 }
 0x494   : > { %p1859_p5 = pnand %p1858_p3, %p2263_p9 }
 0x495   : > { %p1864_p6 = por %p1863_p0, %p1862_p2 }
 0x496   : > { %p1860_p13 = pneg %p1859_p5 }
 0x498   : > { %p1865_p12 = pnand %p1864_p6, %p1860_p13 }
 0x49a   : > { %1868 = shalt.err (!%p1865_p12)
}
 0x49b   : > { %s1935_s10 = smov 64   ;;  %s1936_s24 = smov 4  }
 0x49c   : > { %1579 = dma.vmem_to_hbm [thread:$0]  (%p2263_p9), %s2191_s12, 320, %s2189_s25, %s1218_s4, %s1935_s10, %s1935_s10, %s1936_s24  }
 0x49d PF: > { %s1246_s23 = sand.u32 1, %s1903_s27   ;;  %p2264_p11 = scmp.ne.s32.totalorder %s2252_s18, 0 }
 0x49e   : > { %s1247_s13 = scalar_lea.sflag [#allocation4], %s1246_s23 }
 0x49f   : > { %p1595_p4 = pnand %p1348_p7, %p2264_p11 }
 0x4a1   : > { %p1596_p8 = pneg %p1595_p4 }
 0x4a3   : > { %1898 = dma.done.wait (%p1596_p8), %s1247_s13, 320  }
 0x4a4   : > { %1900 = vsyncadd (%p1596_p8), %s1247_s13, 4294966976  ;;  %p23_p10 = scmp.ge.s32.totalorder %s2007_s11, 4   ;;  %s2265_s27 = smov %s1907_s28 }
 0x4a5   : > { %s2266_s28 = smov %s1911_s29  ;;  %s2267_s29 = smov %s2019_s14 }
 0x4a6   : > { %s2268_s30 = smov %s2007_s11  ;;  %25 = sbr.rel (!%p23_p10) target bundleno = 12 (0xc), region = 118 }
 0x4ab   :  { %1252 = vsyncpa [#allocation3], 1 }
 0x4ac   :  { %1254 = vsyncpa [#allocation3 + $0x1], 1 }
 0x4ad   :  { %1255 = vsyncpa [#allocation6], 1 }
 0x4ae   :  { %1256 = vsyncpa [#allocation9], 1 }
 0x4af   :  { %1257 = vsyncpa [#allocation4], 1 }
 0x4b0   :  { %1259 = vsyncpa [#allocation4 + $0x1], 1 }

</bundles_post_ra>
